<compile_context>
chip_gen: v6e
topology: v6e:2x2x1
jax: 0.10.0
libtpu: 0.0.40
codegen_flags: <defaults>
</compile_context>

<pallas_src>
import functools

import jax
import jax.numpy as jnp
from jax import lax
from jax.experimental import pallas as pl
from jax.experimental.pallas import tpu as pltpu

_LEAKY_SLOPE = 0.01  # torch.nn.LeakyReLU default (identity here, see above)


# ------------------------------ sizing helpers -------------------------------
def _round_up(v, m):
    return ((v + m - 1) // m) * m


def _round_down_128(v):
    return max(128, (v // 128) * 128)


def _vmem_limits():
    """Returns (vmem_limit_bytes for CompilerParams, working-set budget bytes)."""
    try:
        cap = int(pltpu.get_tpu_info().vmem_capacity_bytes)
    except Exception:
        cap = 64 * 1024 * 1024  # assume the smallest part (v7x: 64 MiB)
    # Raise the scoped limit (v5e default is only 16 MiB) but leave headroom:
    # 3/4 of physical, capped at 96 MiB (v5e/v6e) / 48 MiB (v7x).
    limit = min((cap * 3) // 4, 96 * 1024 * 1024)
    return limit, limit // 2


def _cparams(sem, vmem_limit):
    return pltpu.CompilerParams(dimension_semantics=sem,
                                vmem_limit_bytes=vmem_limit)


# --------------------- fused single-pass kernel (x read once) ----------------
def _cam_fused_kernel(x_ref, gamma_ref, out_ref):
    xt = x_ref[0]                                              # (C, Np)
    # energy = x @ x.T (contract over the pixel axis), f32 accumulation on MXU.
    # TODO(synk): bf16 operand cast for large-C (MXU-bound) deployments.
    energy = lax.dot_general(xt, xt, (((1,), (1,)), ((), ())),
                             preferred_element_type=jnp.float32)
    # rowmax - energy >= 0, so LeakyReLU is the identity; gamma folded in.
    att = gamma_ref[0] * (jnp.max(energy, axis=-1, keepdims=True) - energy)
    out = jnp.dot(att, xt.astype(jnp.float32),
                  preferred_element_type=jnp.float32)
    out_ref[0] = (out + xt.astype(jnp.float32)).astype(out_ref.dtype)


# --------------- tiled pass 1: partial energy accumulation (split) -----------
def _energy_kernel(x_ref, part_ref):
    j = pl.program_id(2)

    @pl.when(j == 0)
    def _():
        part_ref[...] = jnp.zeros_like(part_ref)

    xt = x_ref[0]                                              # (C, tn)
    part_ref[0, 0] += lax.dot_general(
        xt, xt, (((1,), (1,)), ((), ())), preferred_element_type=jnp.float32)


# ----- tiled pass 1b: sum split partials, rowmax-subtract, fold gamma in -----
def _finalize_kernel(part_ref, gamma_ref, att_ref):
    energy = jnp.sum(part_ref[0], axis=0)                      # (C, C)
    att_ref[0] = gamma_ref[0] * (jnp.max(energy, axis=-1, keepdims=True)
                                 - energy)


# ---------------- tiled pass 2: out_tile = att @ x_tile + x_tile -------------
def _apply_kernel(att_ref, x_ref, out_ref):
    att = att_ref[0]                                           # (C, C) f32
    xt = x_ref[0]                                              # (C, tn)
    out = jnp.dot(att, xt.astype(jnp.float32),
                  preferred_element_type=jnp.float32)
    out_ref[0] = (out + xt.astype(jnp.float32)).astype(out_ref.dtype)


# ---------------------------------- wrapper ----------------------------------
@functools.partial(jax.jit, static_argnames=("force_tiled", "tn_override"))
def cam_forward(x, gamma, *, force_tiled=False, tn_override=None):
    B, C, H, W = x.shape
    N = H * W
    isz = max(jnp.dtype(x.dtype).itemsize, 4)
    vmem_limit, budget = _vmem_limits()
    gamma = gamma.reshape((1,)).astype(jnp.float32)

    # ---- fused path: the whole per-batch (C, Np) slab fits the VMEM budget --
    Np = _round_up(N, 128)
    fused_ws = 6 * C * Np * isz + 4 * C * C * 4
    if (not force_tiled) and fused_ws <= budget:
        xf = x.reshape(B, C, N)
        if Np != N:
            xf = jnp.pad(xf, ((0, 0), (0, 0), (0, Np - N)))
        out = pl.pallas_call(
            _cam_fused_kernel,
            grid=(B,),
            in_specs=[pl.BlockSpec((1, C, Np), lambda b: (b, 0, 0)),
                      pl.BlockSpec(memory_space=pltpu.MemorySpace.SMEM)],
            out_specs=pl.BlockSpec((1, C, Np), lambda b: (b, 0, 0)),
            out_shape=jax.ShapeDtypeStruct((B, C, Np), x.dtype),
            compiler_params=_cparams(("parallel",), vmem_limit),
        )(xf, gamma)
        return out[:, :, :N].reshape(B, C, H, W)

    # ---- tiled two-pass fallback (large N) -----------------------------------
    if tn_override is not None:
        tn = _round_down_128(int(tn_override))
    else:
        tn = _round_down_128(budget // (6 * C * isz))   # ~6 live (C,tn) buffers
    tn = min(tn, _round_up(N, 128))
    Np = _round_up(N, tn)
    nt = Np // tn
    nsplit = 2 if (nt % 2 == 0 and nt >= 2) else 1      # 2 TCs on v7x at B==1
    nth = nt // nsplit

    xf = x.reshape(B, C, N)
    if Np != N:
        xf = jnp.pad(xf, ((0, 0), (0, 0), (0, Np - N)))

    part = pl.pallas_call(
        _energy_kernel,
        grid=(B, nsplit, nth),
        in_specs=[pl.BlockSpec((1, C, tn),
                               lambda b, s, j: (b, 0, s * nth + j))],
        out_specs=pl.BlockSpec((1, 1, C, C), lambda b, s, j: (b, s, 0, 0)),
        out_shape=jax.ShapeDtypeStruct((B, nsplit, C, C), jnp.float32),
        compiler_params=_cparams(("parallel", "parallel", "arbitrary"),
                                 vmem_limit),
    )(xf)

    att = pl.pallas_call(
        _finalize_kernel,
        grid=(B,),
        in_specs=[pl.BlockSpec((1, nsplit, C, C), lambda b: (b, 0, 0, 0)),
                  pl.BlockSpec(memory_space=pltpu.MemorySpace.SMEM)],
        out_specs=pl.BlockSpec((1, C, C), lambda b: (b, 0, 0)),
        out_shape=jax.ShapeDtypeStruct((B, C, C), jnp.float32),
        compiler_params=_cparams(("parallel",), vmem_limit),
    )(part, gamma)

    out = pl.pallas_call(
        _apply_kernel,
        grid=(B, nt),
        in_specs=[pl.BlockSpec((1, C, C), lambda b, j: (b, 0, 0)),
                  pl.BlockSpec((1, C, tn), lambda b, j: (b, 0, j))],
        out_specs=pl.BlockSpec((1, C, tn), lambda b, j: (b, 0, j)),
        out_shape=jax.ShapeDtypeStruct((B, C, Np), x.dtype),
        compiler_params=_cparams(("parallel", "parallel"), vmem_limit),
    )(att, xf)

    return out[:, :, :N].reshape(B, C, H, W)


# --------------------------- pure-JAX reference ------------------------------
def cam_reference(x, gamma):
    B, C, H, W = x.shape
    xf = x.reshape(B, C, H * W)
    hi = jax.lax.Precision.HIGHEST
    energy = jnp.einsum("bcn,bdn->bcd", xf, xf, precision=hi)
    energy_new = jnp.max(energy, axis=-1, keepdims=True) - energy
    attention = jnp.where(energy_new >= 0, energy_new,
                          _LEAKY_SLOPE * energy_new)
    out = jnp.einsum("bcd,bdn->bcn", attention, xf, precision=hi)
    out = gamma[0] * out + xf
    return out.reshape(B, C, H, W)


if __name__ == "__main__":
    root = jax.random.PRNGKey(0)
    k1, k2, k3 = jax.random.split(root, 3)
    # PyTorch inits gamma to 0 (then out == x); use 0.5 so attention matters.
    gamma = jnp.full((1,), 0.5, jnp.float32)

    # 1) fused path (per-batch (C, N) slab easily fits the VMEM budget)
    x1 = jax.random.normal(k1, (2, 16, 16, 16), jnp.float32)
    out1 = jax.block_until_ready(cam_forward(x1, gamma))
    assert out1.shape == x1.shape
    assert jnp.allclose(out1, cam_reference(x1, gamma), rtol=1e-3, atol=1e-2)

    # 2) tiled two-pass fallback, forced, with small tn so the split-accumulate
    #    reduction and the finalize kernel are exercised.
    x2 = jax.random.normal(k2, (2, 16, 32, 32), jnp.float32)
    out2 = jax.block_until_ready(
        cam_forward(x2, gamma, force_tiled=True, tn_override=128))
    assert out2.shape == x2.shape
    assert jnp.allclose(out2, cam_reference(x2, gamma), rtol=1e-3, atol=1e-2)

    # 3) non-128-divisible spatial size (lane padding path)
    x3 = jax.random.normal(k3, (1, 8, 10, 10), jnp.float32)
    out3 = jax.block_until_ready(cam_forward(x3, gamma))
    assert out3.shape == x3.shape
    assert jnp.allclose(out3, cam_reference(x3, gamma), rtol=1e-3, atol=1e-2)

    print("KERNEL_OK")
</pallas_src>

<mosaic_0001>
module attributes {stable_mosaic.version = 11 : i64} {
  func.func @_cam_fused_kernel(%arg0: i32, %arg1: memref<1x16x256xf32, #tpu.memory_space<vmem>>, %arg2: memref<1xf32, #tpu.memory_space<smem>>, %arg3: memref<1x16x256xf32, #tpu.memory_space<vmem>>) attributes {dimension_semantics = [#tpu.dimension_semantics<parallel>], iteration_bounds = array<i64: 2>, scalar_prefetch = 0 : i64, scratch_operands = 0 : i64, tpu.core_type = #tpu.core_type<tc>, window_params = [{transform_indices = @transform_0, window_bounds = array<i64: 1, 16, 256>}, {transform_indices = @transform_1, window_bounds = array<i64: 1>}, {transform_indices = @transform_2, window_bounds = array<i64: 1, 16, 256>}]} {
    %c0 = arith.constant 0 : index
    %c0_0 = arith.constant 0 : index
    %c0_1 = arith.constant 0 : index
    %0 = vector.load %arg1[%c0, %c0_0, %c0_1] : memref<1x16x256xf32, #tpu.memory_space<vmem>>, vector<1x16x256xf32>
    %1 = vector.shape_cast %0 : vector<1x16x256xf32> to vector<16x256xf32>
    %cst = arith.constant dense<0.000000e+00> : vector<16x16xf32>
    %2 = tpu.matmul %1, %1, %cst {dimension_numbers = #tpu.dot_dimension_numbers<[1], [1], [0], [0], [0, 0, 1, 0], [], []>} : vector<16x256xf32>, vector<16x256xf32>, vector<16x16xf32> -> vector<16x16xf32>
    %c0_2 = arith.constant 0 : index
    %3 = memref.load %arg2[%c0_2] : memref<1xf32, #tpu.memory_space<smem>>
    %cst_3 = arith.constant dense<0xFF800000> : vector<16xf32>
    %4 = vector.multi_reduction <maximumf>, %2, %cst_3 [1] : vector<16x16xf32> to vector<16xf32>
    %5 = vector.shape_cast %4 : vector<16xf32> to vector<16x1xf32>
    %6 = vector.broadcast %5 : vector<16x1xf32> to vector<16x16xf32>
    %7 = arith.subf %6, %2 : vector<16x16xf32>
    %8 = vector.broadcast %3 : f32 to vector<16x16xf32>
    %9 = arith.mulf %8, %7 : vector<16x16xf32>
    %cst_4 = arith.constant dense<0.000000e+00> : vector<16x256xf32>
    %10 = tpu.matmul %9, %1, %cst_4 {dimension_numbers = #tpu.dot_dimension_numbers<[1], [0], [0], [1], [0, 0, 1, 1], [], []>} : vector<16x16xf32>, vector<16x256xf32>, vector<16x256xf32> -> vector<16x256xf32>
    %11 = arith.addf %10, %1 : vector<16x256xf32>
    %c0_5 = arith.constant 0 : index
    %c0_6 = arith.constant 0 : index
    %c0_7 = arith.constant 0 : index
    %12 = vector.load %arg3[%c0_5, %c0_6, %c0_7] : memref<1x16x256xf32, #tpu.memory_space<vmem>>, vector<1x16x256xf32>
    %13 = vector.shape_cast %12 : vector<1x16x256xf32> to vector<16x256xf32>
    %14 = vector.shape_cast %11 : vector<16x256xf32> to vector<1x16x256xf32>
    tpu.vector_store %arg3[%c0_5, %c0_6, %c0_7], %14 {strides = array<i32>} : memref<1x16x256xf32, #tpu.memory_space<vmem>>, vector<1x16x256xf32>,
    return
  }
  func.func @transform_0(%arg0: i32) -> (i32, i32, i32) {
    %c0_i32 = arith.constant 0 : i32
    %c0_i32_0 = arith.constant 0 : i32
    %c0_i32_1 = arith.constant 0 : i32
    return %arg0, %c0_i32, %c0_i32_0 : i32, i32, i32
  }
  func.func @transform_1(%arg0: i32) -> i32 {
    %c0_i32 = arith.constant 0 : i32
    %c0_i32_0 = arith.constant 0 : i32
    return %c0_i32 : i32
  }
  func.func @transform_2(%arg0: i32) -> (i32, i32, i32) {
    %c0_i32 = arith.constant 0 : i32
    %c0_i32_0 = arith.constant 0 : i32
    %c0_i32_1 = arith.constant 0 : i32
    return %arg0, %c0_i32, %c0_i32_0 : i32, i32, i32
  }
}

</mosaic_0001>

<bundles_post_ra>
// kernel: cam_forward.1
= control target key start
LH: loop header
LB: loop body
LE: loop exit
PB: predicated region body
PF: predicated region fallthrough
CT: control target
= control target key end

     0   :  { %s430_s11 = smov 0   ;;  %s458_s0 = inlined_call_operand.vmem [shape: f32[2,16,256], index: 0, kind: input, shape index: {}]   ;;  %s459_s1 = inlined_call_operand.<no memory space> [shape: f32[1], index: 1, kind: input, shape index: {}]   ;;  %s460_s2 = inlined_call_operand.vmem [shape: f32[2,16,256], index: 2, kind: output, shape index: {}]  }
   0x1   :  { %7 = sst [smem:[#allocation2]] %s459_s1 }
   0x2 LB: > { %s379_s12 = sadd.s32 4294967295, %s409_s11   ;;  %p383_p0 = scmp.ge.s32.totalorder %s409_s11, 1  ;;  %s409_s11 = sphi %s430_s11, %s13_s11  }
   0x3   : > { %p113_p1 = scmp.lt.s32.totalorder %s409_s11, 3 }
   0x5   : > { %p114_p2 = pnand %p383_p0, %p113_p1 }
   0x6   : > { %p135_p3 = scmp.lt.s32.totalorder (!%p114_p2), %s379_s12, 1  ;;  %s224_s16 = sld [smem:[#allocation2]] (!%p114_p2) }
   0x7   : > { %117 = sbr.rel (%p114_p2) target bundleno = 562 (0x232), region = 28 }
   0xc   : > { %s462_s12 = smov (!%p135_p3, %s379_s12), 1  ;;  %vm225_vm0 = vcmask 130048   ;;  %v411_v10 = vmov 0.0   ;;  %v234_v11 = vstv %s224_s16 }
   0xd   : > { %s392_s1 = sshll.u32 %s462_s12, 5  ;;  %307 = vmatprep.mubr.f32.mxu1 %v411_v10 }
   0xe   : > { %s139_s15 = scalar_lea.vmem %s458_s0, %s392_s1  ;;  %s144_s19 = scalar_lea.vmem %s460_s2, %s392_s1 }
   0xf   : > { %v148_v0 = vld [vmem:[%s139_s15 + $0x18] sm:$0xff]  ;;  %v147_v1 = vld [vmem:[%s139_s15 + $0x10] sm:$0xff]  ;;  %v146_v2 = vld [vmem:[%s139_s15 + $0x8] sm:$0xff] }
  0x10   : > { %177 = vmatprep.subr.mxu0 %v148_v0  ;;  %213 = vmatprep.mubr.f32.mxu0 %v146_v2  ;;  %v145_v3 = vld [vmem:[%s139_s15] sm:$0xff] }
  0x11   : > { %178 = vmatpush1.xpose.msra.mxu0 %v147_v1  ;;  %271 = vmatprep.subr.mxu1 %v148_v0 }
  0x12   : > { %179 = vmatprep.subr.mxu0 %v146_v2  ;;  %272 = vmatpush1.msra.mxu1 %v147_v1 }
  0x13   : > { %273 = vmatprep.subr.mxu1 %v146_v2 }
  0x14   : > { %274 = vmatpush1.msra.mxu1 %v145_v3 }
  0x15   : > { %180 = vmatpush1.xpose.msra.mxu0 %v145_v3 }
  0x18   : > { %214 = vmatmul.mubr.f32.vlgmr.msra.gmra.mxu0 %v145_v3 }
  0x19   : > { %218 = vmatprep.mubr.f32.mxu0 %v148_v0 }
  0x1c   : > { %219 = vmatmul.mubr.f32.gmra.mxu0 %v147_v1 }
  0xd8   : > { %v215_v4 = vpop.f32.mrf.mxu0 }
  0xd9   : > { %v226_v5 = vsel %vm225_vm0, %v215_v4, -inf }
  0xda   : > { %227 = vmax.xlane.f32.xlu0 %v226_v5  ;;  %v217_v6 = vpop.f32.mrf.mxu0 }
  0xdc   : > { %v220_v7 = vpop.f32.mrf.mxu0 }
  0xdd   : > { %v229_v8 = vsel %vm225_vm0, %v220_v7, -inf }
  0xde   : > { %230 = vmax.xlane.f32.xlu0 %v229_v8  ;;  %v222_v9 = vpop.f32.mrf.mxu0 }
 0x163   : > { %v228_v12 = vpop.xlane.xlu0 %227 }
 0x164   : > { %v232_v13 = vsub.f32 %v228_v12, %v215_v4 }
 0x166   : > { %v235_v14 = vmul.f32 %v234_v11, %v232_v13 }
 0x167   : > { %v231_v15 = vpop.xlane.xlu0 %230 }
 0x168   : > { %v233_v16 = vsub.f32 %v231_v15, %v220_v7  ;;  %388 = vmatmul.mubr.msk.f32.vlgmr.msra.gmra.mxu1 %vm225_vm0, %v235_v14 }
 0x169   : > { %313 = vmatprep.mubr.f32.mxu1 %v411_v10 }
 0x16a   : > { %v236_v17 = vmul.f32 %v234_v11, %v233_v16 }
 0x16c   : > { %389 = vmatmul.mubr.msk.f32.gmra.mxu1 %vm225_vm0, %v236_v17 }
 0x228   : > { %v309_v18 = vpop.f32.mrf.mxu1 }
 0x229   : > { %v310_v19 = vadd.f32 %v309_v18, %v145_v3 }
 0x22a   : > { %v311_v20 = vpop.f32.mrf.mxu1 }
 0x22b   : > { %320 = vst [vmem:[%s144_s19] sm:$0xff] %v310_v19  ;;  %v312_v21 = vadd.f32 %v311_v20, %v146_v2 }
 0x22c   : > { %v315_v22 = vpop.f32.mrf.mxu1 }
 0x22d   : > { %321 = vst [vmem:[%s144_s19 + $0x8] sm:$0xff] %v312_v21  ;;  %v316_v23 = vadd.f32 %v315_v22, %v147_v1 }
 0x22e   : > { %v317_v24 = vpop.f32.mrf.mxu1 }
 0x22f   : > { %322 = vst [vmem:[%s144_s19 + $0x10] sm:$0xff] %v316_v23  ;;  %v318_v25 = vadd.f32 %v317_v24, %v148_v0 }
 0x231   : > { %323 = vst [vmem:[%s144_s19 + $0x18] sm:$0xff] %v318_v25 }
 0x232 PF: > { %s13_s11 = sadd.s32 1, %s409_s11  }
 0x233   : > { %p10_p4 = scmp.ge.s32.totalorder %s13_s11, 4  }
 0x235   :  { %12 = sbr.rel (!%p10_p4) target bundleno = 2 (0x2), region = 58 }

</bundles_post_ra>
